<compile_context>
chip_gen: v7x
topology: tpu7x:2x2x1
jax: 0.10.0
libtpu: 0.0.40
codegen_flags: <defaults>
</compile_context>

<pallas_src>
import functools

import jax
import jax.numpy as jnp
from jax import lax
from jax.experimental import pallas as pl
from jax.experimental.pallas import tpu as pltpu

_LANES = 128
_SUBLANES = 8
_HIGHEST = jax.lax.Precision.HIGHEST


def _round_up(n, m):
    return ((n + m - 1) // m) * m


def _kvmem_kernel(q_ref, kT_ref, v_ref, out_ref, *, topk, mem_size):
    # q_ref:   (tb, C_pad)     spatial-mean query, zero-padded
    # kT_ref:  (C_pad, M_pad)  pre-normalized, pre-transposed keys (resident)
    # v_ref:   (M_pad, V_pad)  values, zero-padded (resident)
    # out_ref: (tb, V_pad)
    q = q_ref[...]

    # F.normalize(q, dim=1) == q * rsqrt(max(||q||^2, eps^2))  (EUP slot)
    ss = jnp.sum(q * q, axis=1, keepdims=True)
    q_norm = q * lax.rsqrt(jnp.maximum(ss, jnp.float32(1e-24)))

    # Cosine similarity on the MXU: plain row-major contraction, keys were
    # transposed in the wrapper so no in-kernel relayout of the key tile.
    sim = jnp.dot(q_norm, kT_ref[...], preferred_element_type=jnp.float32,
                  precision=_HIGHEST)                            # (tb, M_pad)

    m_pad = sim.shape[1]
    neg_inf = jnp.float32(-jnp.inf)
    # Single (1, M_pad) f32 index row; all compares broadcast it, so no
    # persistent (tb, M_pad) index tile stays live across the top-k loop.
    col_idx = lax.broadcasted_iota(jnp.int32, (1, m_pad), 1).astype(jnp.float32)

    # Padded memory slots must never win the top-k; skip when there are none.
    if m_pad > mem_size:
        work = jnp.where(col_idx < jnp.float32(mem_size), sim, neg_inf)
    else:
        work = sim

    chunk = 128
    n_chunks = m_pad // chunk
    use_two_stage = (n_chunks > 1) and (topk * n_chunks < m_pad)

    if use_two_stage:
        # Stage 1: per 128-lane chunk knockout -> topk (value, global index)
        # candidates per chunk.  Every reduction spans exactly one vreg, so
        # the XLU trees are fixed-cost and the serialized knockout dependency
        # chain only covers 128 lanes.
        lidx = lax.broadcasted_iota(jnp.int32, (1, chunk), 1).astype(jnp.float32)
        cand_vals = []
        cand_gidx = []
        for c in range(n_chunks):
            wc = work[:, c * chunk:(c + 1) * chunk]
            for _ in range(topk):
                m_t = jnp.max(wc, axis=1, keepdims=True)
                li = jnp.min(jnp.where(wc == m_t, lidx, jnp.float32(chunk)),
                             axis=1, keepdims=True)              # tie: lowest idx
                cand_vals.append(m_t)
                cand_gidx.append(li + jnp.float32(c * chunk))
                wc = jnp.where(lidx == li, neg_inf, wc)
        sel_vals = jnp.concatenate(cand_vals, axis=1)   # (tb, topk*n_chunks)
        sel_idx = jnp.concatenate(cand_gidx, axis=1)    # (tb, topk*n_chunks)
    else:
        sel_vals, sel_idx = work, col_idx

    # Stage 2 / direct path: global knockout over the (small) candidate tile.
    # Unnormalized softmax weights (relative to m0 = largest similarity) are
    # scattered onto the full memory axis so the gather + weighted sum
    # collapse into a single MXU matmul.  Tie-break: lowest global index
    # (matches jax.lax.top_k).
    w_full = jnp.zeros_like(sim)
    m0 = None
    denom = None
    for t in range(topk):
        m_t = jnp.max(sel_vals, axis=1, keepdims=True)
        gi = jnp.min(jnp.where(sel_vals == m_t, sel_idx, jnp.float32(m_pad)),
                     axis=1, keepdims=True)                      # (tb, 1)
        if t == 0:
            m0 = m_t
            e = jnp.ones_like(m_t)                               # exp(0)
            denom = e
        else:
            e = jnp.exp(m_t - m0)                                # EUP
            denom = denom + e
        w_full = w_full + e * (col_idx == gi).astype(jnp.float32)
        sel_vals = jnp.where(sel_idx == gi, neg_inf, sel_vals)   # knockout winner

    # matched = softmax(topk_sim) @ values == (w_full @ values) / denom
    matched = jnp.dot(w_full, v_ref[...], preferred_element_type=jnp.float32,
                      precision=_HIGHEST)
    out_ref[...] = (matched * (1.0 / denom)).astype(out_ref.dtype)   # exact divide


def prepare_key_value_memory(keys, values):
    """One-time parameter prep (hoisted out of the per-call path).

    Normalizes the keys, transposes them to (key_dim, mem_size), and zero-pads
    keys^T / values to lane-dense multiples of 128.
    """
    mem_size, key_dim = keys.shape
    mem_size_v, value_dim = values.shape
    assert mem_size == mem_size_v

    c_pad = _round_up(key_dim, _LANES)
    m_pad = _round_up(mem_size, _LANES)
    v_pad = _round_up(value_dim, _LANES)

    k32 = keys.astype(jnp.float32)
    k_norm = k32 / jnp.maximum(jnp.linalg.norm(k32, axis=1, keepdims=True), 1e-12)
    kT_p = jnp.pad(k_norm.T, ((0, c_pad - key_dim), (0, m_pad - mem_size)))
    v_p = jnp.pad(values.astype(jnp.float32),
                  ((0, m_pad - mem_size), (0, v_pad - value_dim)))
    return {
        "keys_t": kT_p,          # (C_pad, M_pad)
        "values": v_p,           # (M_pad, V_pad)
        "mem_size": mem_size,
        "key_dim": key_dim,
        "value_dim": value_dim,
    }


def key_value_memory_forward(x, params, topk):
    """Pallas implementation of KeyValueMemory.forward.

    x: (B, C, H, W) float32, C must equal key_dim.  Returns (B, value_dim, H, W).
    """
    B, C, H, W = x.shape
    mem_size = params["mem_size"]
    key_dim = params["key_dim"]
    value_dim = params["value_dim"]
    kT_p = params["keys_t"]
    v_p = params["values"]
    c_pad, m_pad = kT_p.shape
    _, v_pad = v_p.shape
    assert C == key_dim, "channel dim must equal key_dim"
    assert 1 <= topk <= mem_size, "topk must be in [1, mem_size]"

    # Spatial mean hoisted to plain JAX (fused reduce is bandwidth-optimal);
    # the kernel never streams the (B, C, H, W) activation.
    q = x.reshape(B, C, H * W).mean(axis=2).astype(jnp.float32)

    # Batch tile: multiple of the f32 sublane count, capped at 128, and (when
    # B allows it) small enough to give >= 2 grid steps so the "parallel"
    # batch axis can shard across both v7x TensorCores.
    if B > _SUBLANES:
        tb = min(_LANES, _round_up(pl.cdiv(B, 2), _SUBLANES))
    else:
        tb = _round_up(max(B, 1), _SUBLANES)
    b_pad = _round_up(B, tb)

    q_p = jnp.pad(q, ((0, b_pad - B), (0, c_pad - C)))

    # VMEM budget: single-buffered residents + double-buffered q/out streams.
    resident_bytes = (c_pad * m_pad + m_pad * v_pad) * 4
    stream_bytes = 2 * (tb * c_pad + tb * v_pad) * 4
    needed = resident_bytes + stream_bytes
    vmem_limit = int(min(max(needed * 5 // 4 + (4 << 20), 32 << 20), 64 << 20))

    cost = pl.CostEstimate(
        flops=2 * b_pad * m_pad * (c_pad + v_pad),
        transcendentals=b_pad * (topk + 1),
        bytes_accessed=4 * (b_pad * c_pad + c_pad * m_pad
                            + m_pad * v_pad + b_pad * v_pad),
    )

    matched_p = pl.pallas_call(
        functools.partial(_kvmem_kernel, topk=topk, mem_size=mem_size),
        out_shape=jax.ShapeDtypeStruct((b_pad, v_pad), jnp.float32),
        grid_spec=pltpu.PrefetchScalarGridSpec(
            num_scalar_prefetch=0,
            grid=(b_pad // tb,),
            in_specs=[
                # q stream: default double-buffering across batch tiles.
                pl.BlockSpec((tb, c_pad), lambda i: (i, 0)),
                # keys^T / values: constant index_map -> resident across grid
                # steps; single-buffered so they do not pay 2x VMEM.
                pl.BlockSpec((c_pad, m_pad), lambda i: (0, 0),
                             pipeline_mode=pl.Buffered(1)),
                pl.BlockSpec((m_pad, v_pad), lambda i: (0, 0),
                             pipeline_mode=pl.Buffered(1)),
            ],
            out_specs=pl.BlockSpec((tb, v_pad), lambda i: (i, 0)),
        ),
        compiler_params=pltpu.CompilerParams(
            dimension_semantics=("parallel",),     # independent batch tiles
            vmem_limit_bytes=vmem_limit),
        cost_estimate=cost,
    )(q_p, kT_p, v_p)

    matched = matched_p[:B, :value_dim]
    # .unsqueeze(-1).unsqueeze(-1).expand(-1, -1, H, W)
    return jnp.broadcast_to(matched[:, :, None, None], (B, value_dim, H, W))


def _reference_forward(x, keys, values, topk):
    """Pure-JAX reference mirroring the PyTorch module."""
    B, C, H, W = x.shape
    q = x.reshape(B, C, -1).mean(axis=2)
    q_norm = q / jnp.maximum(jnp.linalg.norm(q, axis=1, keepdims=True), 1e-12)
    k_norm = keys / jnp.maximum(
        jnp.linalg.norm(keys, axis=1, keepdims=True), 1e-12)
    sim = jnp.matmul(q_norm, k_norm.T, precision=_HIGHEST)
    topk_sim, topk_idx = jax.lax.top_k(sim, topk)
    weights = jax.nn.softmax(topk_sim, axis=1)
    selected = values[topk_idx]                      # (B, topk, V)
    matched = jnp.sum(weights[..., None] * selected, axis=1)
    return jnp.broadcast_to(matched[:, :, None, None],
                            (B, values.shape[1], H, W))


if __name__ == "__main__":
    def _run_case(B, C, H, W, mem_size, value_dim, topk):
        key = jax.random.PRNGKey(0)
        kx, kk, kv = jax.random.split(key, 3)
        x = jax.random.normal(kx, (B, C, H, W), dtype=jnp.float32)
        keys_p = jax.random.normal(kk, (mem_size, C), dtype=jnp.float32)
        values_p = jax.random.normal(kv, (mem_size, value_dim), dtype=jnp.float32)

        prepared = prepare_key_value_memory(keys_p, values_p)
        out = key_value_memory_forward(x, prepared, topk)
        out = jax.block_until_ready(out)

        ref = _reference_forward(x, keys_p, values_p, topk)
        assert out.shape == (B, value_dim, H, W)
        err = float(jnp.max(jnp.abs(out - ref)))
        assert err < 1e-5, f"mismatch vs reference: {err}"

    # Case 1: shapes consistent with the module's forward (single-tile path).
    _run_case(B=2, C=32, H=8, W=8, mem_size=40, value_dim=32, topk=5)
    # Case 2: multi-chunk memory + multi-step batch grid (two-stage top-k,
    # Buffered(1) residents held across grid steps).
    _run_case(B=20, C=48, H=4, W=4, mem_size=300, value_dim=24, topk=5)

    print("KERNEL_OK")
</pallas_src>

<mosaic_0001>
module attributes {stable_mosaic.version = 11 : i64} {
  func.func @_kvmem_kernel(%arg0: i32, %arg1: memref<8x128xf32, #tpu.memory_space<vmem>>, %arg2: memref<128x128xf32, #tpu.memory_space<vmem>>, %arg3: memref<128x128xf32, #tpu.memory_space<vmem>>, %arg4: memref<8x128xf32, #tpu.memory_space<vmem>>) attributes {dimension_semantics = [#tpu.dimension_semantics<parallel>], iteration_bounds = array<i64: 1>, scalar_prefetch = 0 : i64, scratch_operands = 0 : i64, tpu.core_type = #tpu.core_type<tc>, window_params = [{transform_indices = @transform_0, window_bounds = array<i64: 8, 128>}, {pipeline_mode = #tpu.pipeline_mode<synchronous>, transform_indices = @transform_1, window_bounds = array<i64: 128, 128>}, {pipeline_mode = #tpu.pipeline_mode<synchronous>, transform_indices = @transform_2, window_bounds = array<i64: 128, 128>}, {transform_indices = @transform_3, window_bounds = array<i64: 8, 128>}]} {
    %c0 = arith.constant 0 : index
    %c0_0 = arith.constant 0 : index
    %0 = vector.load %arg1[%c0, %c0_0] : memref<8x128xf32, #tpu.memory_space<vmem>>, vector<8x128xf32>
    %1 = arith.mulf %0, %0 : vector<8x128xf32>
    %cst = arith.constant dense<0.000000e+00> : vector<8xf32>
    %2 = vector.multi_reduction <add>, %1, %cst [1] : vector<8x128xf32> to vector<8xf32>
    %3 = vector.shape_cast %2 : vector<8xf32> to vector<8x1xf32>
    %cst_1 = arith.constant 1.000000e-24 : f32
    %4 = vector.broadcast %cst_1 : f32 to vector<8x1xf32>
    %5 = arith.maximumf %3, %4 : vector<8x1xf32>
    %6 = math.rsqrt %5 : vector<8x1xf32>
    %7 = vector.broadcast %6 : vector<8x1xf32> to vector<8x128xf32>
    %8 = arith.mulf %0, %7 : vector<8x128xf32>
    %c0_2 = arith.constant 0 : index
    %c0_3 = arith.constant 0 : index
    %9 = vector.load %arg2[%c0_2, %c0_3] : memref<128x128xf32, #tpu.memory_space<vmem>>, vector<128x128xf32>
    %cst_4 = arith.constant dense<0.000000e+00> : vector<8x128xf32>
    %10 = tpu.matmul %8, %9, %cst_4 {dimension_numbers = #tpu.dot_dimension_numbers<[1], [0], [0], [1], [0, 0, 1, 1], [], []>, precision = #tpu.contract_precision<fp32>} : vector<8x128xf32>, vector<128x128xf32>, vector<8x128xf32> -> vector<8x128xf32>
    %11 = tpu.iota {dimensions = array<i32: 1>} : vector<1x128xi32>
    %12 = arith.sitofp %11 : vector<1x128xi32> to vector<1x128xf32>
    %cst_5 = arith.constant 4.000000e+01 : f32
    %13 = vector.broadcast %cst_5 : f32 to vector<1x128xf32>
    %14 = arith.cmpf olt, %12, %13 : vector<1x128xf32>
    %cst_6 = arith.constant 0xFF800000 : f32
    %15 = vector.shape_cast %14 : vector<1x128xi1> to vector<1x128xi1>
    %16 = vector.broadcast %15 : vector<1x128xi1> to vector<8x128xi1>
    %17 = vector.broadcast %cst_6 : f32 to vector<8x128xf32>
    %18 = arith.select %16, %10, %17 : vector<8x128xi1>, vector<8x128xf32>
    %cst_7 = arith.constant 0.000000e+00 : f32
    %19 = vector.broadcast %cst_7 : f32 to vector<8x128xf32>
    %cst_8 = arith.constant dense<0xFF800000> : vector<8xf32>
    %20 = vector.multi_reduction <maximumf>, %18, %cst_8 [1] : vector<8x128xf32> to vector<8xf32>
    %21 = vector.shape_cast %20 : vector<8xf32> to vector<8x1xf32>
    %22 = vector.broadcast %21 : vector<8x1xf32> to vector<8x128xf32>
    %23 = arith.cmpf oeq, %18, %22 : vector<8x128xf32>
    %cst_9 = arith.constant 1.280000e+02 : f32
    %24 = vector.shape_cast %12 : vector<1x128xf32> to vector<1x128xf32>
    %25 = vector.broadcast %24 : vector<1x128xf32> to vector<8x128xf32>
    %26 = vector.broadcast %cst_9 : f32 to vector<8x128xf32>
    %27 = arith.select %23, %25, %26 : vector<8x128xi1>, vector<8x128xf32>
    %cst_10 = arith.constant dense<0x7F800000> : vector<8xf32>
    %28 = vector.multi_reduction <minimumf>, %27, %cst_10 [1] : vector<8x128xf32> to vector<8xf32>
    %29 = vector.shape_cast %28 : vector<8xf32> to vector<8x1xf32>
    %cst_11 = arith.constant 1.000000e+00 : f32
    %30 = vector.broadcast %cst_11 : f32 to vector<8x1xf32>
    %31 = vector.broadcast %12 : vector<1x128xf32> to vector<8x128xf32>
    %32 = vector.broadcast %29 : vector<8x1xf32> to vector<8x128xf32>
    %33 = arith.cmpf oeq, %31, %32 : vector<8x128xf32>
    %34 = arith.extui %33 : vector<8x128xi1> to vector<8x128xi32>
    %35 = arith.sitofp %34 : vector<8x128xi32> to vector<8x128xf32>
    %36 = vector.broadcast %30 : vector<8x1xf32> to vector<8x128xf32>
    %37 = arith.mulf %36, %35 : vector<8x128xf32>
    %38 = arith.addf %19, %37 : vector<8x128xf32>
    %39 = vector.broadcast %12 : vector<1x128xf32> to vector<8x128xf32>
    %40 = vector.broadcast %29 : vector<8x1xf32> to vector<8x128xf32>
    %41 = arith.cmpf oeq, %39, %40 : vector<8x128xf32>
    %cst_12 = arith.constant 0xFF800000 : f32
    %42 = vector.broadcast %cst_12 : f32 to vector<8x128xf32>
    %43 = arith.select %41, %42, %18 : vector<8x128xi1>, vector<8x128xf32>
    %cst_13 = arith.constant dense<0xFF800000> : vector<8xf32>
    %44 = vector.multi_reduction <maximumf>, %43, %cst_13 [1] : vector<8x128xf32> to vector<8xf32>
    %45 = vector.shape_cast %44 : vector<8xf32> to vector<8x1xf32>
    %46 = vector.broadcast %45 : vector<8x1xf32> to vector<8x128xf32>
    %47 = arith.cmpf oeq, %43, %46 : vector<8x128xf32>
    %cst_14 = arith.constant 1.280000e+02 : f32
    %48 = vector.shape_cast %12 : vector<1x128xf32> to vector<1x128xf32>
    %49 = vector.broadcast %48 : vector<1x128xf32> to vector<8x128xf32>
    %50 = vector.broadcast %cst_14 : f32 to vector<8x128xf32>
    %51 = arith.select %47, %49, %50 : vector<8x128xi1>, vector<8x128xf32>
    %cst_15 = arith.constant dense<0x7F800000> : vector<8xf32>
    %52 = vector.multi_reduction <minimumf>, %51, %cst_15 [1] : vector<8x128xf32> to vector<8xf32>
    %53 = vector.shape_cast %52 : vector<8xf32> to vector<8x1xf32>
    %54 = arith.subf %45, %21 : vector<8x1xf32>
    %55 = math.exp %54 : vector<8x1xf32>
    %56 = arith.addf %30, %55 : vector<8x1xf32>
    %57 = vector.broadcast %12 : vector<1x128xf32> to vector<8x128xf32>
    %58 = vector.broadcast %53 : vector<8x1xf32> to vector<8x128xf32>
    %59 = arith.cmpf oeq, %57, %58 : vector<8x128xf32>
    %60 = arith.extui %59 : vector<8x128xi1> to vector<8x128xi32>
    %61 = arith.sitofp %60 : vector<8x128xi32> to vector<8x128xf32>
    %62 = vector.broadcast %55 : vector<8x1xf32> to vector<8x128xf32>
    %63 = arith.mulf %62, %61 : vector<8x128xf32>
    %64 = arith.addf %38, %63 : vector<8x128xf32>
    %65 = vector.broadcast %12 : vector<1x128xf32> to vector<8x128xf32>
    %66 = vector.broadcast %53 : vector<8x1xf32> to vector<8x128xf32>
    %67 = arith.cmpf oeq, %65, %66 : vector<8x128xf32>
    %cst_16 = arith.constant 0xFF800000 : f32
    %68 = vector.broadcast %cst_16 : f32 to vector<8x128xf32>
    %69 = arith.select %67, %68, %43 : vector<8x128xi1>, vector<8x128xf32>
    %cst_17 = arith.constant dense<0xFF800000> : vector<8xf32>
    %70 = vector.multi_reduction <maximumf>, %69, %cst_17 [1] : vector<8x128xf32> to vector<8xf32>
    %71 = vector.shape_cast %70 : vector<8xf32> to vector<8x1xf32>
    %72 = vector.broadcast %71 : vector<8x1xf32> to vector<8x128xf32>
    %73 = arith.cmpf oeq, %69, %72 : vector<8x128xf32>
    %cst_18 = arith.constant 1.280000e+02 : f32
    %74 = vector.shape_cast %12 : vector<1x128xf32> to vector<1x128xf32>
    %75 = vector.broadcast %74 : vector<1x128xf32> to vector<8x128xf32>
    %76 = vector.broadcast %cst_18 : f32 to vector<8x128xf32>
    %77 = arith.select %73, %75, %76 : vector<8x128xi1>, vector<8x128xf32>
    %cst_19 = arith.constant dense<0x7F800000> : vector<8xf32>
    %78 = vector.multi_reduction <minimumf>, %77, %cst_19 [1] : vector<8x128xf32> to vector<8xf32>
    %79 = vector.shape_cast %78 : vector<8xf32> to vector<8x1xf32>
    %80 = arith.subf %71, %21 : vector<8x1xf32>
    %81 = math.exp %80 : vector<8x1xf32>
    %82 = arith.addf %56, %81 : vector<8x1xf32>
    %83 = vector.broadcast %12 : vector<1x128xf32> to vector<8x128xf32>
    %84 = vector.broadcast %79 : vector<8x1xf32> to vector<8x128xf32>
    %85 = arith.cmpf oeq, %83, %84 : vector<8x128xf32>
    %86 = arith.extui %85 : vector<8x128xi1> to vector<8x128xi32>
    %87 = arith.sitofp %86 : vector<8x128xi32> to vector<8x128xf32>
    %88 = vector.broadcast %81 : vector<8x1xf32> to vector<8x128xf32>
    %89 = arith.mulf %88, %87 : vector<8x128xf32>
    %90 = arith.addf %64, %89 : vector<8x128xf32>
    %91 = vector.broadcast %12 : vector<1x128xf32> to vector<8x128xf32>
    %92 = vector.broadcast %79 : vector<8x1xf32> to vector<8x128xf32>
    %93 = arith.cmpf oeq, %91, %92 : vector<8x128xf32>
    %cst_20 = arith.constant 0xFF800000 : f32
    %94 = vector.broadcast %cst_20 : f32 to vector<8x128xf32>
    %95 = arith.select %93, %94, %69 : vector<8x128xi1>, vector<8x128xf32>
    %cst_21 = arith.constant dense<0xFF800000> : vector<8xf32>
    %96 = vector.multi_reduction <maximumf>, %95, %cst_21 [1] : vector<8x128xf32> to vector<8xf32>
    %97 = vector.shape_cast %96 : vector<8xf32> to vector<8x1xf32>
    %98 = vector.broadcast %97 : vector<8x1xf32> to vector<8x128xf32>
    %99 = arith.cmpf oeq, %95, %98 : vector<8x128xf32>
    %cst_22 = arith.constant 1.280000e+02 : f32
    %100 = vector.shape_cast %12 : vector<1x128xf32> to vector<1x128xf32>
    %101 = vector.broadcast %100 : vector<1x128xf32> to vector<8x128xf32>
    %102 = vector.broadcast %cst_22 : f32 to vector<8x128xf32>
    %103 = arith.select %99, %101, %102 : vector<8x128xi1>, vector<8x128xf32>
    %cst_23 = arith.constant dense<0x7F800000> : vector<8xf32>
    %104 = vector.multi_reduction <minimumf>, %103, %cst_23 [1] : vector<8x128xf32> to vector<8xf32>
    %105 = vector.shape_cast %104 : vector<8xf32> to vector<8x1xf32>
    %106 = arith.subf %97, %21 : vector<8x1xf32>
    %107 = math.exp %106 : vector<8x1xf32>
    %108 = arith.addf %82, %107 : vector<8x1xf32>
    %109 = vector.broadcast %12 : vector<1x128xf32> to vector<8x128xf32>
    %110 = vector.broadcast %105 : vector<8x1xf32> to vector<8x128xf32>
    %111 = arith.cmpf oeq, %109, %110 : vector<8x128xf32>
    %112 = arith.extui %111 : vector<8x128xi1> to vector<8x128xi32>
    %113 = arith.sitofp %112 : vector<8x128xi32> to vector<8x128xf32>
    %114 = vector.broadcast %107 : vector<8x1xf32> to vector<8x128xf32>
    %115 = arith.mulf %114, %113 : vector<8x128xf32>
    %116 = arith.addf %90, %115 : vector<8x128xf32>
    %117 = vector.broadcast %12 : vector<1x128xf32> to vector<8x128xf32>
    %118 = vector.broadcast %105 : vector<8x1xf32> to vector<8x128xf32>
    %119 = arith.cmpf oeq, %117, %118 : vector<8x128xf32>
    %cst_24 = arith.constant 0xFF800000 : f32
    %120 = vector.broadcast %cst_24 : f32 to vector<8x128xf32>
    %121 = arith.select %119, %120, %95 : vector<8x128xi1>, vector<8x128xf32>
    %cst_25 = arith.constant dense<0xFF800000> : vector<8xf32>
    %122 = vector.multi_reduction <maximumf>, %121, %cst_25 [1] : vector<8x128xf32> to vector<8xf32>
    %123 = vector.shape_cast %122 : vector<8xf32> to vector<8x1xf32>
    %124 = vector.broadcast %123 : vector<8x1xf32> to vector<8x128xf32>
    %125 = arith.cmpf oeq, %121, %124 : vector<8x128xf32>
    %cst_26 = arith.constant 1.280000e+02 : f32
    %126 = vector.shape_cast %12 : vector<1x128xf32> to vector<1x128xf32>
    %127 = vector.broadcast %126 : vector<1x128xf32> to vector<8x128xf32>
    %128 = vector.broadcast %cst_26 : f32 to vector<8x128xf32>
    %129 = arith.select %125, %127, %128 : vector<8x128xi1>, vector<8x128xf32>
    %cst_27 = arith.constant dense<0x7F800000> : vector<8xf32>
    %130 = vector.multi_reduction <minimumf>, %129, %cst_27 [1] : vector<8x128xf32> to vector<8xf32>
    %131 = vector.shape_cast %130 : vector<8xf32> to vector<8x1xf32>
    %132 = arith.subf %123, %21 : vector<8x1xf32>
    %133 = math.exp %132 : vector<8x1xf32>
    %134 = arith.addf %108, %133 : vector<8x1xf32>
    %135 = vector.broadcast %12 : vector<1x128xf32> to vector<8x128xf32>
    %136 = vector.broadcast %131 : vector<8x1xf32> to vector<8x128xf32>
    %137 = arith.cmpf oeq, %135, %136 : vector<8x128xf32>
    %138 = arith.extui %137 : vector<8x128xi1> to vector<8x128xi32>
    %139 = arith.sitofp %138 : vector<8x128xi32> to vector<8x128xf32>
    %140 = vector.broadcast %133 : vector<8x1xf32> to vector<8x128xf32>
    %141 = arith.mulf %140, %139 : vector<8x128xf32>
    %142 = arith.addf %116, %141 : vector<8x128xf32>
    %c0_28 = arith.constant 0 : index
    %c0_29 = arith.constant 0 : index
    %143 = vector.load %arg3[%c0_28, %c0_29] : memref<128x128xf32, #tpu.memory_space<vmem>>, vector<128x128xf32>
    %cst_30 = arith.constant dense<0.000000e+00> : vector<8x128xf32>
    %144 = tpu.matmul %142, %143, %cst_30 {dimension_numbers = #tpu.dot_dimension_numbers<[1], [0], [0], [1], [0, 0, 1, 1], [], []>, precision = #tpu.contract_precision<fp32>} : vector<8x128xf32>, vector<128x128xf32>, vector<8x128xf32> -> vector<8x128xf32>
    %cst_31 = arith.constant 1.000000e+00 : f32
    %145 = vector.broadcast %cst_31 : f32 to vector<8x1xf32>
    %146 = arith.divf %145, %134 : vector<8x1xf32>
    %147 = vector.broadcast %146 : vector<8x1xf32> to vector<8x128xf32>
    %148 = arith.mulf %144, %147 : vector<8x128xf32>
    %c0_32 = arith.constant 0 : index
    %c0_33 = arith.constant 0 : index
    %149 = vector.load %arg4[%c0_32, %c0_33] : memref<8x128xf32, #tpu.memory_space<vmem>>, vector<8x128xf32>
    tpu.vector_store %arg4[%c0_32, %c0_33], %148 {strides = array<i32>} : memref<8x128xf32, #tpu.memory_space<vmem>>, vector<8x128xf32>,
    return
  }
  func.func @transform_0(%arg0: i32) -> (i32, i32) {
    %c0_i32 = arith.constant 0 : i32
    %c0_i32_0 = arith.constant 0 : i32
    return %arg0, %c0_i32 : i32, i32
  }
  func.func @transform_1(%arg0: i32) -> (i32, i32) {
    %c0_i32 = arith.constant 0 : i32
    %c0_i32_0 = arith.constant 0 : i32
    %c0_i32_1 = arith.constant 0 : i32
    return %c0_i32, %c0_i32_0 : i32, i32
  }
  func.func @transform_2(%arg0: i32) -> (i32, i32) {
    %c0_i32 = arith.constant 0 : i32
    %c0_i32_0 = arith.constant 0 : i32
    %c0_i32_1 = arith.constant 0 : i32
    return %c0_i32, %c0_i32_0 : i32, i32
  }
  func.func @transform_3(%arg0: i32) -> (i32, i32) {
    %c0_i32 = arith.constant 0 : i32
    %c0_i32_0 = arith.constant 0 : i32
    return %arg0, %c0_i32 : i32, i32
  }
}

</mosaic_0001>

<bundles_post_ra>
// kernel: tpu_custom_call.1
= control target key start
LH: loop header
LB: loop body
LE: loop exit
PB: predicated region body
PF: predicated region fallthrough
CT: control target
= control target key end

     0   :  { %8 = vsyncpa [#allocation3], 0  ;;  %s3177_s0 = inlined_call_operand.hbm [shape: f32[8,128], index: 0, kind: input, shape index: {}]   ;;  %s3178_s1 = inlined_call_operand.hbm [shape: f32[128,128], index: 1, kind: input, shape index: {}]   ;;  %s3179_s2 = inlined_call_operand.hbm [shape: f32[128,128], index: 2, kind: input, shape index: {}]   ;;  %s3180_s3 = inlined_call_operand.hbm [shape: f32[8,128], index: 3, kind: output, shape index: {}]  }
   0x1   :  { %9 = vsyncpa [#allocation6], 0 }
   0x2   :  { %10 = vsyncpa [#allocation4], 0  ;;  %s2528_s12 = smov [#allocation5]   ;;  %s2434_s16 = scalar_lea.hbm %s3178_s1, 2048 }
   0x3   :  { %s26_s13 = sshll.u32 %s2528_s12, 4  ;;  %p2435_p0 = scmp.ne.s32.totalorder %s3178_s1, %s2434_s16  ;;  %s27_s13 = int_to_ptr.vmem [resolvable:$true] %s26_s13 }
   0x4   :  { %p2438_p1 = scmp.lt.u32.totalorder %s2434_s16, %s3178_s1 }
   0x6   :  { %p2440_p2 = pnand %p2438_p1, %p2435_p0 }
   0x8   :  { %2443 = shalt.err (!%p2440_p2)
}
   0x9   :  { %s2444_s21 = scalar_lea.vmem %s27_s13, 2048  ;;  %p2449_p4 = scmp.lt.s32.totalorder %s27_s13, %s27_s13 }
   0xa   :  { %p2445_p3 = scmp.ne.s32.totalorder %s27_s13, %s2444_s21  ;;  %p2450_p5 = scmp.lt.s32.totalorder %s2444_s21, %s2444_s21 }
   0xc   :  { %p2451_p6 = por %p2450_p5, %p2449_p4 }
   0xe   :  { %p2452_p7 = pnand %p2451_p6, %p2445_p3 }
  0x10   :  { %2455 = shalt.err (!%p2452_p7)
}
  0x11   :  { %s2529_s22 = smov 128   ;;  %s2530_s23 = smov 8  }
  0x12   :  { %32 = dma.hbm_to_vmem [thread:$0]  %s3178_s1, 2048, %s27_s13, [#allocation6], %s2529_s22, %s2529_s22, %s2530_s23  }
  0x13   :  { %s2531_s26 = smov [#allocation2]   ;;  %s2532_s28 = smov [#allocation7]  }
  0x14   :  { %s17_s27 = sshll.u32 %s2531_s26, 4  ;;  %s38_s29 = sshll.u32 %s2532_s28, 4  ;;  %s18_s27 = int_to_ptr.vmem [resolvable:$true] %s17_s27  ;;  %s39_s29 = int_to_ptr.vmem [resolvable:$true] %s38_s29 }
  0x15   :  { %s2456_s5 = scalar_lea.hbm %s3177_s0, 128 }
  0x16   :  { %p2457_p8 = scmp.ne.s32.totalorder %s3177_s0, %s2456_s5  ;;  %p2460_p9 = scmp.lt.u32.totalorder %s2456_s5, %s3177_s0 }
  0x18   :  { %p2462_p10 = pnand %p2460_p9, %p2457_p8 }
  0x1a   :  { %2465 = shalt.err (!%p2462_p10)
}
  0x1b   :  { %s2466_s1 = scalar_lea.vmem %s18_s27, 128  ;;  %p2471_p12 = scmp.lt.s32.totalorder %s18_s27, %s18_s27 }
  0x1c   :  { %p2467_p11 = scmp.ne.s32.totalorder %s18_s27, %s2466_s1  ;;  %p2472_p13 = scmp.lt.s32.totalorder %s2466_s1, %s2466_s1 }
  0x1e   :  { %p2473_p0 = por %p2472_p13, %p2471_p12 }
  0x20   :  { %p2474_p1 = pnand %p2473_p0, %p2467_p11 }
  0x22   :  { %2477 = shalt.err (!%p2474_p1)
}
  0x23   :  { %20 = dma.hbm_to_vmem [thread:$0]  %s3177_s0, 128, %s18_s27, [#allocation3]  }
  0x24   :  { %s2478_s14 = scalar_lea.hbm %s3179_s2, 2048 }
  0x25   :  { %p2479_p2 = scmp.ne.s32.totalorder %s3179_s2, %s2478_s14  ;;  %p2482_p3 = scmp.lt.u32.totalorder %s2478_s14, %s3179_s2 }
  0x27   :  { %p2484_p4 = pnand %p2482_p3, %p2479_p2 }
  0x29   :  { %2487 = shalt.err (!%p2484_p4)
}
  0x2a   :  { %s2488_s19 = scalar_lea.vmem %s39_s29, 2048  ;;  %p2493_p6 = scmp.lt.s32.totalorder %s39_s29, %s39_s29 }
  0x2b   :  { %p2489_p5 = scmp.ne.s32.totalorder %s39_s29, %s2488_s19  ;;  %p2494_p7 = scmp.lt.s32.totalorder %s2488_s19, %s2488_s19 }
  0x2d   :  { %p2495_p8 = por %p2494_p7, %p2493_p6 }
  0x2f   :  { %p2496_p9 = pnand %p2495_p8, %p2489_p5 }
  0x31   :  { %2499 = shalt.err (!%p2496_p9)
}
  0x32   :  { %44 = dma.hbm_to_vmem [thread:$0]  %s3179_s2, 2048, %s39_s29, [#allocation6], %s2529_s22, %s2529_s22, %s2530_s23  }
  0x33   :  { %2522 = dma.done.wait [#allocation3], 128  }
  0x34   :  { %2523 = vsyncadd [#allocation3], 4294967168 }
  0x35   :  { %2524 = dma.done.wait [#allocation6], 4096  }
  0x36   :  { %2525 = vsyncadd [#allocation6], 4294963200  ;;  %v2533_v0 = vmov 0.0|0.0   ;;  %v2601_v1 = vld [vmem:[#allocation2] sm:$0xff]  ;;  %v61_v2 = vld [vmem:[#allocation5] sm:$0xff]  ;;  %vm2534_vm0 = vmmov 0  }
  0x37   :  { %2105 = vmatprep.subr.bf16.mxu0 %v2533_v0  ;;  %2249 = vmatprep.subr.bf16.mxu1 %v2533_v0  ;;  %v62_v3 = vld [vmem:[#allocation5 + $0x8] sm:$0xff]  ;;  %v55_v4 = vmul.f32 %v2601_v1, %v2601_v1  ;;  %v78_v5 = vand.u32 4294901760, %v61_v2  ;;  %v63_v7 = vld [vmem:[#allocation5 + $0x10] sm:$0xff]  ;;  %v64_v8 = vld [vmem:[#allocation5 + $0x18] sm:$0xff]  ;;  %v2535_v38 = vmov 0.0   ;;  %s2536_s2 = smov [#allocation8]  }
  0x38   :  { %v81_v6 = vand.u32 4294901760, %v62_v3  ;;  %v84_v9 = vand.u32 4294901760, %v63_v7  ;;  %v87_v10 = vand.u32 4294901760, %v64_v8  ;;  %v65_v17 = vld [vmem:[#allocation5 + $0x20] sm:$0xff]  ;;  %v66_v18 = vld [vmem:[#allocation5 + $0x28] sm:$0xff]  ;;  %v67_v22 = vld [vmem:[#allocation5 + $0x30] sm:$0xff]  ;;  %1717 = vmatprep.mubr.msk.f32.mxu0 %vm2534_vm0, %v2535_v38  ;;  %1927 = vmatprep.mubr.msk.f32.mxu1 %vm2534_vm0, %v2535_v38 }
  0x39   :  { %56 = vadd.xlane.f32.xlu0 %v55_v4  ;;  %v2607_v12 = vsub.f32 %v61_v2, %v78_v5  ;;  %v90_v19 = vand.u32 4294901760, %v65_v17  ;;  %v93_v20 = vand.u32 4294901760, %v66_v18  ;;  %v68_v23 = vld [vmem:[#allocation5 + $0x38] sm:$0xff]  ;;  %v96_v24 = vand.u32 4294901760, %v67_v22  ;;  %v69_v28 = vld [vmem:[#allocation5 + $0x40] sm:$0xff]  ;;  %v70_v29 = vld [vmem:[#allocation5 + $0x48] sm:$0xff] }
  0x3a   :  { %v2605_v11 = vpack.c.bf16 %v81_v6, %v78_v5  ;;  %v2609_v13 = vsub.f32 %v62_v3, %v81_v6  ;;  %v2611_v14 = vsub.f32 %v63_v7, %v84_v9  ;;  %v2613_v15 = vsub.f32 %v64_v8, %v87_v10  ;;  %v71_v30 = vld [vmem:[#allocation5 + $0x50] sm:$0xff]  ;;  %v72_v35 = vld [vmem:[#allocation5 + $0x58] sm:$0xff]  ;;  %v73_v36 = vld [vmem:[#allocation5 + $0x60] sm:$0xff]  ;;  %s1466_s21 = sshll.u32 %s2536_s2, 4  ;;  %s1467_s21 = int_to_ptr.vmem [resolvable:$true] %s1466_s21 }
  0x3b   :  { %v2616_v16 = vpack.c.bf16 %v87_v10, %v84_v9  ;;  %v2621_v21 = vpack.c.bf16 %v93_v20, %v90_v19  ;;  %v99_v25 = vand.u32 4294901760, %v68_v23  ;;  %v2624_v26 = vsub.f32 %v65_v17, %v90_v19  ;;  %v74_v37 = vld [vmem:[#allocation5 + $0x68] sm:$0xff]  ;;  %v75_v42 = vld [vmem:[#allocation5 + $0x70] sm:$0xff]  ;;  %v76_v43 = vld [vmem:[#allocation5 + $0x78] sm:$0xff]  ;;  %s2500_s22 = scalar_lea.vmem %s1467_s21, 128  ;;  %p2505_p11 = scmp.lt.s32.totalorder %s1467_s21, %s1467_s21 }
  0x3c   :  { %2107 = vmatpush3.bf16.msra.mxu0 %v2605_v11  ;;  %v2626_v27 = vsub.f32 %v66_v18, %v93_v20  ;;  %v2631_v32 = vsub.f32 %v67_v22, %v96_v24  ;;  %v102_v34 = vand.u32 4294901760, %v69_v28  ;;  %v105_v39 = vand.u32 4294901760, %v70_v29  ;;  %p2501_p10 = scmp.ne.s32.totalorder %s1467_s21, %s2500_s22  ;;  %p2506_p12 = scmp.lt.s32.totalorder %s2500_s22, %s2500_s22 }
  0x3d   :  { %2108 = vmatprep.subr.bf16.mxu0 %v2533_v0  ;;  %v2629_v31 = vpack.c.bf16 %v99_v25, %v96_v24  ;;  %v2633_v33 = vsub.f32 %v68_v23, %v99_v25  ;;  %v108_v40 = vand.u32 4294901760, %v71_v30  ;;  %v111_v41 = vand.u32 4294901760, %v72_v35 }
  0x3e   :  { %v2640_v44 = vsub.f32 %v69_v28, %v102_v34  ;;  %v114_v45 = vand.u32 4294901760, %v73_v36  ;;  %v117_v46 = vand.u32 4294901760, %v74_v37  ;;  %v120_v47 = vand.u32 4294901760, %v75_v42  ;;  %p2507_p13 = por %p2506_p12, %p2505_p11 }
  0x3f   :  { %v2643_v48 = vpack.c.bf16 %v105_v39, %v102_v34  ;;  %v2645_v49 = vsub.f32 %v70_v29, %v105_v39  ;;  %v2647_v50 = vsub.f32 %v71_v30, %v108_v40  ;;  %v123_v51 = vand.u32 4294901760, %v76_v43 }
  0x40   :  { %2110 = vmatpush3.bf16.msra.mxu0 %v2616_v16  ;;  %v2649_v52 = vsub.f32 %v72_v35, %v111_v41  ;;  %v2651_v53 = vsub.f32 %v73_v36, %v114_v45  ;;  %v2653_v54 = vsub.f32 %v74_v37, %v117_v46  ;;  %v2655_v55 = vsub.f32 %v75_v42, %v120_v47  ;;  %p2508_p0 = pnand %p2507_p13, %p2501_p10 }
  0x41   :  { %2111 = vmatprep.subr.bf16.mxu0 %v2533_v0  ;;  %v2657_v56 = vsub.f32 %v76_v43, %v123_v51  ;;  %v2660_v57 = vpack.c.bf16 %v111_v41, %v108_v40  ;;  %v2664_v58 = vpack.c.bf16 %v117_v46, %v114_v45  ;;  %v2668_v59 = vpack.c.bf16 %v123_v51, %v120_v47 }
  0x42   :  { %v171_v60 = vand.u32 4294901760, %v2607_v12  ;;  %v178_v61 = vand.u32 4294901760, %v2609_v13  ;;  %v185_v4 = vand.u32 4294901760, %v2611_v14  ;;  %v192_v5 = vand.u32 4294901760, %v2613_v15 }
  0x43   :  { %v199_v17 = vand.u32 4294901760, %v2624_v26  ;;  %v206_v18 = vand.u32 4294901760, %v2626_v27  ;;  %v213_v25 = vand.u32 4294901760, %v2631_v32  ;;  %v220_v28 = vand.u32 4294901760, %v2633_v33 }
  0x44   :  { %2113 = vmatpush3.bf16.msra.mxu0 %v2621_v21  ;;  %v172_v62 = vsub.f32 %v2607_v12, %v171_v60  ;;  %v179_v63 = vsub.f32 %v2609_v13, %v178_v61  ;;  %v186_v7 = vsub.f32 %v2611_v14, %v185_v4  ;;  %v193_v8 = vsub.f32 %v2613_v15, %v192_v5 }
  0x45   :  { %2114 = vmatprep.subr.bf16.mxu0 %v2533_v0  ;;  %v200_v20 = vsub.f32 %v2624_v26, %v199_v17  ;;  %v207_v22 = vsub.f32 %v2626_v27, %v206_v18  ;;  %v214_v30 = vsub.f32 %v2631_v32, %v213_v25  ;;  %v221_v34 = vsub.f32 %v2633_v33, %v220_v28 }
  0x46   :  { %v173_v2 = vand.u32 4294901760, %v172_v62  ;;  %v180_v3 = vand.u32 4294901760, %v179_v63  ;;  %v187_v9 = vand.u32 4294901760, %v186_v7  ;;  %v194_v10 = vand.u32 4294901760, %v193_v8 }
  0x47   :  { %v201_v23 = vand.u32 4294901760, %v200_v20  ;;  %v208_v24 = vand.u32 4294901760, %v207_v22  ;;  %v215_v35 = vand.u32 4294901760, %v214_v30  ;;  %v222_v36 = vand.u32 4294901760, %v221_v34 }
  0x48   :  { %2116 = vmatpush3.bf16.msra.mxu0 %v2629_v31  ;;  %v2683_v6 = vpack.c.bf16 %v180_v3, %v173_v2  ;;  %v2133_v19 = vpack.c.bf16 %v194_v10, %v187_v9  ;;  %v227_v37 = vand.u32 4294901760, %v2640_v44  ;;  %v234_v39 = vand.u32 4294901760, %v2645_v49 }
  0x49   :  { %2117 = vmatprep.subr.bf16.mxu0 %v2533_v0  ;;  %v2136_v29 = vpack.c.bf16 %v208_v24, %v201_v23  ;;  %v2139_v40 = vpack.c.bf16 %v222_v36, %v215_v35  ;;  %v241_v46 = vand.u32 4294901760, %v2647_v50  ;;  %v248_v47 = vand.u32 4294901760, %v2649_v52 }
  0x4a   :  { %v228_v41 = vsub.f32 %v2640_v44, %v227_v37  ;;  %v235_v42 = vsub.f32 %v2645_v49, %v234_v39  ;;  %v3184_v7 = vand.u32 4294901760, %v2651_v53  ;;  %v3183_v8 = vand.u32 4294901760, %v2653_v54 }
  0x4b   :  { %v242_v62 = vsub.f32 %v2647_v50, %v241_v46  ;;  %v249_v63 = vsub.f32 %v2649_v52, %v248_v47  ;;  %v3182_v24 = vand.u32 4294901760, %v2655_v55  ;;  %v3181_v30 = vand.u32 4294901760, %v2657_v56 }
  0x4c   :  { %2119 = vmatpush3.bf16.msra.mxu0 %v2643_v48  ;;  %v229_v43 = vand.u32 4294901760, %v228_v41  ;;  %v236_v45 = vand.u32 4294901760, %v235_v42  ;;  %v256_v10 = vsub.f32 %v2651_v53, %v3184_v7  ;;  %v263_v20 = vsub.f32 %v2653_v54, %v3183_v8 }
  0x4d   :  { %2120 = vmatprep.subr.bf16.mxu0 %v2533_v0  ;;  %v243_v2 = vand.u32 4294901760, %v242_v62  ;;  %v250_v3 = vand.u32 4294901760, %v249_v63  ;;  %v270_v35 = vsub.f32 %v2655_v55, %v3182_v24  ;;  %v277_v36 = vsub.f32 %v2657_v56, %v3181_v30 }
  0x4e   :  { %v2142_v51 = vpack.c.bf16 %v236_v45, %v229_v43  ;;  %v257_v22 = vand.u32 4294901760, %v256_v10  ;;  %v264_v23 = vand.u32 4294901760, %v263_v20  ;;  %v2154_v45 = vpack.c.bf16 %v2609_v13, %v2607_v12 }
  0x4f   :  { %v2145_v9 = vpack.c.bf16 %v250_v3, %v243_v2  ;;  %v271_v41 = vand.u32 4294901760, %v270_v35  ;;  %v278_v42 = vand.u32 4294901760, %v277_v36  ;;  %v2157_v62 = vpack.c.bf16 %v2613_v15, %v2611_v14 }
  0x50   :  { %2122 = vmatpush3.bf16.msra.mxu0 %v2660_v57  ;;  %v2148_v34 = vpack.c.bf16 %v264_v23, %v257_v22  ;;  %v2160_v63 = vpack.c.bf16 %v2626_v27, %v2624_v26  ;;  %v2163_v2 = vpack.c.bf16 %v2633_v33, %v2631_v32  ;;  %v2166_v3 = vpack.c.bf16 %v2645_v49, %v2640_v44 }
  0x51   :  { %2123 = vmatprep.subr.bf16.mxu0 %v2533_v0  ;;  %v2151_v43 = vpack.c.bf16 %v278_v42, %v271_v41  ;;  %v2169_v10 = vpack.c.bf16 %v2649_v52, %v2647_v50  ;;  %v2172_v20 = vpack.c.bf16 %v2653_v54, %v2651_v53  ;;  %v2175_v22 = vpack.c.bf16 %v2657_v56, %v2655_v55 }
  0x52   :  { %v2208_v12 = vpack.c.bf16 %v206_v18, %v199_v17  ;;  %v2211_v13 = vpack.c.bf16 %v220_v28, %v213_v25  ;;  %v2214_v14 = vpack.c.bf16 %v234_v39, %v227_v37  ;;  %v2217_v15 = vpack.c.bf16 %v248_v47, %v241_v46 }
  0x53   :  { %v3197_v26 = vand.u32 4294901760, %v2651_v53  ;;  %v3198_v27 = vand.u32 4294901760, %v2653_v54  ;;  %v3199_v33 = vand.u32 4294901760, %v2655_v55  ;;  %v3200_v44 = vand.u32 4294901760, %v2657_v56 }
  0x54   :  { %2125 = vmatpush3.bf16.msra.mxu0 %v2664_v58 }
  0x55   :  { %2126 = vmatprep.subr.bf16.mxu0 %v2533_v0  ;;  %v2220_v32 = vpack.c.bf16 %v3198_v27, %v3197_v26  ;;  %v2223_v49 = vpack.c.bf16 %v3200_v44, %v3199_v33 }
  0x58   :  { %2128 = vmatpush3.bf16.msra.mxu0 %v2668_v59 }
  0x59   :  { %2129 = vmatprep.subr.bf16.mxu0 %v2533_v0 }
  0xc6   :  { %v57_v23 = vpop.xlane.xlu0 %56 }
  0xc7   :  { %v58_v35 = vmax.f32 %v57_v23, 1e-24 }
  0xc9   :  { %2422 = vrsqrt.f32 %v58_v35  ;;  %v802_v35 = vld [vmem:[#allocation7 + $0x18] sm:$0xff] }
  0xd3   :  { %v2423_v36 = vpop.eup %2422 }
  0xd4   :  { %v60_v41 = vmul.f32 %v2423_v36, %v2601_v1  ;;  %v2202_v1 = vpack.c.bf16 %v178_v61, %v171_v60 }
  0xd6   :  { %v2756_v42 = vand.u32 4294901760, %v60_v41 }
  0xd8   :  { %v159_v30 = vsub.f32 %v60_v41, %v2756_v42  ;;  %v803_v41 = vld [vmem:[#allocation7 + $0x20] sm:$0xff] }
  0xda   :  { %v160_v24 = vand.u32 4294901760, %v159_v30 }
  0xdc   :  { %v161_v8 = vsub.f32 %v159_v30, %v160_v24 }
  0xde   :  { %v162_v7 = vand.u32 4294901760, %v161_v8 }
  0xe0   :  { %1718 = vmatmul.mubr.f32.vlgmr.msra.gmra.mrb[0].mxu0 %v162_v7 }
  0xe1   :  { %2131 = vmatpush3.bf16.msra.mxu0 %v2683_v6  ;;  %1752 = vmatprep.mubr.msk.f32.mxu0 %vm2534_vm0, %v2535_v38  ;;  %v2205_v6 = vpack.c.bf16 %v192_v5, %v185_v4 }
  0xe2   :  { %2132 = vmatprep.subr.bf16.mxu0 %v2533_v0 }
  0xe5   :  { %2134 = vmatpush3.bf16.msra.mxu0 %v2133_v19 }
  0xe6   :  { %2135 = vmatprep.subr.bf16.mxu0 %v2533_v0 }
  0xe9   :  { %2137 = vmatpush3.bf16.msra.mxu0 %v2136_v29 }
  0xea   :  { %2138 = vmatprep.subr.bf16.mxu0 %v2533_v0 }
  0xed   :  { %2140 = vmatpush3.bf16.msra.mxu0 %v2139_v40 }
  0xee   :  { %2141 = vmatprep.subr.bf16.mxu0 %v2533_v0 }
  0xf1   :  { %2143 = vmatpush3.bf16.msra.mxu0 %v2142_v51 }
  0xf2   :  { %2144 = vmatprep.subr.bf16.mxu0 %v2533_v0 }
  0xf5   :  { %2146 = vmatpush3.bf16.msra.mxu0 %v2145_v9 }
  0xf6   :  { %2147 = vmatprep.subr.bf16.mxu0 %v2533_v0 }
  0xf9   :  { %2149 = vmatpush3.bf16.msra.mxu0 %v2148_v34 }
  0xfa   :  { %2150 = vmatprep.subr.bf16.mxu0 %v2533_v0 }
  0xfd   :  { %2152 = vmatpush3.bf16.msra.mxu0 %v2151_v43 }
  0xfe   :  { %2153 = vmatprep.subr.bf16.mxu0 %v2533_v0 }
 0x100   :  { %1753 = vmatmul.mubr.f32.vlgmr.msra.gmra.mrb[0].mxu0 %v2756_v42 }
 0x101   :  { %2155 = vmatpush3.bf16.msra.mxu0 %v2154_v45  ;;  %1787 = vmatprep.mubr.msk.f32.mxu0 %vm2534_vm0, %v2535_v38 }
 0x102   :  { %2156 = vmatprep.subr.bf16.mxu0 %v2533_v0 }
 0x105   :  { %2158 = vmatpush3.bf16.msra.mxu0 %v2157_v62 }
 0x106   :  { %2159 = vmatprep.subr.bf16.mxu0 %v2533_v0 }
 0x109   :  { %2161 = vmatpush3.bf16.msra.mxu0 %v2160_v63 }
 0x10a   :  { %2162 = vmatprep.subr.bf16.mxu0 %v2533_v0 }
 0x10d   :  { %2164 = vmatpush3.bf16.msra.mxu0 %v2163_v2 }
 0x10e   :  { %2165 = vmatprep.subr.bf16.mxu0 %v2533_v0 }
 0x111   :  { %2167 = vmatpush3.bf16.msra.mxu0 %v2166_v3  ;;  %v799_v3 = vld [vmem:[#allocation7] sm:$0xff] }
 0x112   :  { %2168 = vmatprep.subr.bf16.mxu0 %v2533_v0 }
 0x115   :  { %2170 = vmatpush3.bf16.msra.mxu0 %v2169_v10  ;;  %v800_v10 = vld [vmem:[#allocation7 + $0x8] sm:$0xff] }
 0x116   :  { %2171 = vmatprep.subr.bf16.mxu0 %v2533_v0  ;;  %v819_v23 = vand.u32 4294901760, %v800_v10 }
 0x118   :  { %v2900_v27 = vsub.f32 %v800_v10, %v819_v23 }
 0x119   :  { %2173 = vmatpush3.bf16.msra.mxu0 %v2172_v20  ;;  %v801_v20 = vld [vmem:[#allocation7 + $0x10] sm:$0xff] }
 0x11a   :  { %2174 = vmatprep.subr.bf16.mxu0 %v2533_v0  ;;  %v822_v36 = vand.u32 4294901760, %v801_v20 }
 0x11d   :  { %2176 = vmatpush3.bf16.msra.mxu0 %v2175_v22  ;;  %v816_v22 = vand.u32 4294901760, %v799_v3 }
 0x11e   :  { %2177 = vmatprep.subr.bf16.mxu0 %v2533_v0 }
 0x11f   :  { %v2898_v26 = vsub.f32 %v799_v3, %v816_v22  ;;  %v916_v3 = vand.u32 4294901760, %v2900_v27 }
 0x120   :  { %1788 = vmatmul.mubr.f32.vlgmr.msra.gmra.mrb[0].mxu0 %v159_v30 }
 0x121   :  { %2179 = vmatpush3.bf16.msra.mxu0 %v2605_v11  ;;  %1822 = vmatprep.mubr.msk.f32.mxu0 %vm2534_vm0, %v2535_v38 }
 0x122   :  { %2180 = vmatprep.subr.bf16.mxu0 %v2533_v0 }
 0x125   :  { %2182 = vmatpush3.bf16.msra.mxu0 %v2616_v16 }
 0x126   :  { %2183 = vmatprep.subr.bf16.mxu0 %v2533_v0 }
 0x129   :  { %2185 = vmatpush3.bf16.msra.mxu0 %v2621_v21 }
 0x12a   :  { %2186 = vmatprep.subr.bf16.mxu0 %v2533_v0 }
 0x12d   :  { %2188 = vmatpush3.bf16.msra.mxu0 %v2629_v31 }
 0x12e   :  { %2189 = vmatprep.subr.bf16.mxu0 %v2533_v0 }
 0x131   :  { %2191 = vmatpush3.bf16.msra.mxu0 %v2643_v48 }
 0x132   :  { %2192 = vmatprep.subr.bf16.mxu0 %v2533_v0 }
 0x135   :  { %2194 = vmatpush3.bf16.msra.mxu0 %v2660_v57 }
 0x136   :  { %2195 = vmatprep.subr.bf16.mxu0 %v2533_v0 }
 0x139   :  { %2197 = vmatpush3.bf16.msra.mxu0 %v2664_v58 }
 0x13a   :  { %2198 = vmatprep.subr.bf16.mxu0 %v2533_v0 }
 0x13d   :  { %2200 = vmatpush3.bf16.msra.mxu0 %v2668_v59 }
 0x13e   :  { %2201 = vmatprep.subr.bf16.mxu0 %v2533_v0 }
 0x140   :  { %1823 = vmatmul.mubr.f32.vlgmr.msra.gmra.mrb[0].mxu0 %v160_v24 }
 0x141   :  { %2203 = vmatpush3.bf16.msra.mxu0 %v2202_v1  ;;  %1857 = vmatprep.mubr.msk.f32.mxu0 %vm2534_vm0, %v2535_v38  ;;  %v825_v1 = vand.u32 4294901760, %v802_v35 }
 0x142   :  { %2204 = vmatprep.subr.bf16.mxu0 %v2533_v0 }
 0x143   :  { %v2904_v33 = vsub.f32 %v802_v35, %v825_v1  ;;  %v917_v35 = vsub.f32 %v2900_v27, %v916_v3 }
 0x145   :  { %2206 = vmatpush3.bf16.msra.mxu0 %v2205_v6  ;;  %v828_v6 = vand.u32 4294901760, %v803_v41 }
 0x146   :  { %2207 = vmatprep.subr.bf16.mxu0 %v2533_v0 }
 0x147   :  { %v2906_v44 = vsub.f32 %v803_v41, %v828_v6  ;;  %v930_v41 = vand.u32 4294901760, %v2904_v33 }
 0x149   :  { %2209 = vmatpush3.bf16.msra.mxu0 %v2208_v12 }
 0x14a   :  { %2210 = vmatprep.subr.bf16.mxu0 %v2533_v0 }
 0x14d   :  { %2212 = vmatpush3.bf16.msra.mxu0 %v2211_v13  ;;  %v805_v13 = vld [vmem:[#allocation7 + $0x30] sm:$0xff] }
 0x14e   :  { %2213 = vmatprep.subr.bf16.mxu0 %v2533_v0 }
 0x151   :  { %2215 = vmatpush3.bf16.msra.mxu0 %v2214_v14  ;;  %v806_v14 = vld [vmem:[#allocation7 + $0x38] sm:$0xff] }
 0x152   :  { %2216 = vmatprep.subr.bf16.mxu0 %v2533_v0 }
 0x155   :  { %2218 = vmatpush3.bf16.msra.mxu0 %v2217_v15  ;;  %v2896_v15 = vpack.c.bf16 %v819_v23, %v816_v22 }
 0x156   :  { %2219 = vmatprep.subr.bf16.mxu0 %v2533_v0 }
 0x157   :  { %2251 = vmatpush3.bf16.msra.mxu1 %v2896_v15 }
 0x158   :  { %2252 = vmatprep.subr.bf16.mxu1 %v2533_v0 }
 0x159   :  { %2221 = vmatpush3.bf16.msra.mxu0 %v2220_v32  ;;  %v2902_v32 = vsub.f32 %v801_v20, %v822_v36 }
 0x15a   :  { %2222 = vmatprep.subr.bf16.mxu0 %v2533_v0 }
 0x15d   :  { %2224 = vmatpush3.bf16.msra.mxu0 %v2223_v49  ;;  %v2909_v49 = vpack.c.bf16 %v825_v1, %v822_v36  ;;  %v923_v36 = vand.u32 4294901760, %v2902_v32  ;;  %v918_v1 = vand.u32 4294901760, %v917_v35 }
 0x15e   :  { %2225 = vmatprep.subr.bf16.mxu0 %v2533_v0 }
 0x15f   :  { %2254 = vmatpush3.bf16.msra.mxu1 %v2909_v49 }
 0x160   :  { %1858 = vmatmul.mubr.f32.vlgmr.msra.gmra.mrb[0].mxu0 %v2756_v42  ;;  %2255 = vmatprep.subr.bf16.mxu1 %v2533_v0 }
 0x161   :  { %2227 = vmatpush3.bf16.msra.mxu0 %v2605_v11  ;;  %1892 = vmatprep.mubr.msk.f32.mxu0 %vm2534_vm0, %v2535_v38  ;;  %v718_v11 = vlaneseq }
 0x162   :  { %2228 = vmatprep.subr.bf16.mxu0 %v2533_v0 }
 0x165   :  { %2230 = vmatpush3.bf16.msra.mxu0 %v2616_v16  ;;  %v719_v16 = vand.u32 127, %v718_v11 }
 0x166   :  { %2231 = vmatprep.subr.bf16.mxu0 %v2533_v0 }
 0x169   :  { %2233 = vmatpush3.bf16.msra.mxu0 %v2621_v21  ;;  %v2860_v21 = vcvt.s32.f32 %v719_v16  ;;  %v834_v16 = vand.u32 4294901760, %v805_v13 }
 0x16a   :  { %2234 = vmatprep.subr.bf16.mxu0 %v2533_v0 }
 0x16b   :  { %vm721_vm1 = vcmp.lt.f32.partialorder %v2860_v21, 40.0 }
 0x16d   :  { %2236 = vmatpush3.bf16.msra.mxu0 %v2629_v31 }
 0x16e   :  { %2237 = vmatprep.subr.bf16.mxu0 %v2533_v0 }
 0x171   :  { %2239 = vmatpush3.bf16.msra.mxu0 %v2643_v48 }
 0x172   :  { %2240 = vmatprep.subr.bf16.mxu0 %v2533_v0 }
 0x175   :  { %2242 = vmatpush3.bf16.msra.mxu0 %v2660_v57 }
 0x176   :  { %2243 = vmatprep.subr.bf16.mxu0 %v2533_v0 }
 0x179   :  { %2245 = vmatpush3.bf16.msra.mxu0 %v2664_v58 }
 0x17a   :  { %2246 = vmatprep.subr.bf16.mxu0 %v2533_v0 }
 0x17d   :  { %2248 = vmatpush3.bf16.msra.mxu0 %v2668_v59 }
 0x180   :  { %1893 = vmatmul.mubr.f32.vlgmr.msra.gmra.mrb[0].mxu0 %v2756_v42  ;;  %v804_v42 = vld [vmem:[#allocation7 + $0x28] sm:$0xff] }
 0x181   :  { %v831_v12 = vand.u32 4294901760, %v804_v42 }
 0x183   :  { %v2911_v11 = vsub.f32 %v804_v42, %v831_v12 }
 0x253   :  { %v714_v31 = vpop.f32.mrb[0].mxu0 }
 0x254   :  { %v724_v48 = vsel %vm721_vm1, %v714_v31, -inf  ;;  %v1894_v50 = vpop.f32.mrb[1].mxu0  ;;  %v837_v31 = vand.u32 4294901760, %v806_v14 }
 0x255   :  { %725 = vmax.xlane.f32.xlu0 %v724_v48 }
 0x256   :  { %v2916_v50 = vsub.f32 %v806_v14, %v837_v31 }
 0x2e2   :  { %v2863_v52 = vpop.xlane.xlu0 %725 }
 0x2e3   :  { %vm727_vm2 = vcmp.eq.f32.partialorder %v724_v48, %v2863_v52 }
 0x2e4   :  { %v728_v53 = vsel %vm727_vm2, %v2860_v21, 128.0 }
 0x2e5   :  { %729 = vmin.xlane.f32.xlu1 %v728_v53  ;;  %v2919_v53 = vpack.c.bf16 %v831_v12, %v828_v6  ;;  %v924_v6 = vsub.f32 %v2902_v32, %v923_v36  ;;  %v931_v12 = vsub.f32 %v2904_v33, %v930_v41 }
 0x2e7   :  { %2257 = vmatpush3.bf16.msra.mxu1 %v2919_v53  ;;  %v925_v14 = vand.u32 4294901760, %v924_v6 }
 0x2e8   :  { %2258 = vmatprep.subr.bf16.mxu1 %v2533_v0 }
 0x372   :  { %v730_v54 = vpop.xlane.xlu1 %729 }
 0x373   :  { %vm731_vm3 = vcmp.eq.f32.partialorder %v2860_v21, %v730_v54  ;;  %v2923_v54 = vpack.c.bf16 %v837_v31, %v834_v16  ;;  %v3196_v31 = vand.u32 4294901760, %v2906_v44 }
 0x374   :  { %v735_v55 = vsel %vm731_vm3, -inf, %v724_v48  ;;  %v1476_v18 = vsel %vm731_vm3, 1.0, %v2535_v38  ;;  %v2914_v48 = vsub.f32 %v805_v13, %v834_v16  ;;  %v932_v16 = vand.u32 4294901760, %v931_v12 }
 0x375   :  { %736 = vmax.xlane.f32.xlu1 %v735_v55  ;;  %2260 = vmatpush3.bf16.msra.mxu1 %v2923_v54 }
 0x376   :  { %2261 = vmatprep.subr.bf16.mxu1 %v2533_v0 }
 0x402   :  { %v737_v56 = vpop.xlane.xlu1 %736 }
 0x403   :  { %vm738_vm4 = vcmp.eq.f32.partialorder %v735_v55, %v737_v56  ;;  %v742_v58 = vsub.f32 %v737_v56, %v2863_v52 }
 0x404   :  { %v739_v57 = vsel %vm738_vm4, %v2860_v21, 128.0 }
 0x405   :  { %740 = vmin.xlane.f32.xlu0 %v739_v57  ;;  %v743_v59 = vmul.f32 1.442695, %v742_v58  ;;  %v807_v57 = vld [vmem:[#allocation7 + $0x40] sm:$0xff]  ;;  %v808_v58 = vld [vmem:[#allocation7 + $0x48] sm:$0xff] }
 0x407   :  { %2424 = vpow2.f32 %v743_v59  ;;  %v840_v59 = vand.u32 4294901760, %v807_v57 }
 0x411   :  { %v2873_v61 = vpop.eup %2424 }
 0x492   :  { %v741_v60 = vpop.xlane.xlu0 %740 }
 0x493   :  { %vm746_vm5 = vcmp.eq.f32.partialorder %v2860_v21, %v741_v60  ;;  %v843_v60 = vand.u32 4294901760, %v808_v58 }
 0x494   :  { %v1477_v4 = vsel %vm746_vm5, 1.0, %v2535_v38  ;;  %v751_v5 = vsel %vm746_vm5, -inf, %v735_v55 }
 0x495   :  { %v749_v17 = vmul.f32 %v2873_v61, %v1477_v4  ;;  %752 = vmax.xlane.f32.xlu1 %v751_v5  ;;  %v2932_v4 = vpack.c.bf16 %v843_v60, %v840_v59 }
 0x497   :  { %v750_v19 = vadd.f32 %v1476_v18, %v749_v17  ;;  %v810_v17 = vld [vmem:[#allocation7 + $0x58] sm:$0xff]  ;;  %2263 = vmatpush3.bf16.msra.mxu1 %v2932_v4 }
 0x498   :  { %2264 = vmatprep.subr.bf16.mxu1 %v2533_v0 }
 0x522   :  { %v753_v25 = vpop.xlane.xlu1 %752 }
 0x523   :  { %vm754_vm6 = vcmp.eq.f32.partialorder %v751_v5, %v753_v25  ;;  %v758_v29 = vsub.f32 %v753_v25, %v2863_v52 }
 0x524   :  { %v755_v28 = vsel %vm754_vm6, %v2860_v21, 128.0 }
 0x525   :  { %756 = vmin.xlane.f32.xlu0 %v755_v28  ;;  %v759_v37 = vmul.f32 1.442695, %v758_v29  ;;  %v811_v28 = vld [vmem:[#allocation7 + $0x60] sm:$0xff]  ;;  %v812_v29 = vld [vmem:[#allocation7 + $0x68] sm:$0xff] }
 0x527   :  { %2426 = vpow2.f32 %v759_v37  ;;  %v852_v37 = vand.u32 4294901760, %v811_v28 }
 0x531   :  { %v2883_v40 = vpop.eup %2426 }
 0x5b2   :  { %v757_v39 = vpop.xlane.xlu0 %756 }
 0x5b3   :  { %vm762_vm7 = vcmp.eq.f32.partialorder %v2860_v21, %v757_v39  ;;  %v855_v39 = vand.u32 4294901760, %v812_v29 }
 0x5b4   :  { %v1478_v46 = vsel %vm762_vm7, 1.0, %v2535_v38  ;;  %v767_v47 = vsel %vm762_vm7, -inf, %v751_v5  ;;  %v809_v5 = vld [vmem:[#allocation7 + $0x50] sm:$0xff] }
 0x5b5   :  { %v765_v51 = vmul.f32 %v2883_v40, %v1478_v46  ;;  %768 = vmax.xlane.f32.xlu1 %v767_v47  ;;  %v846_v18 = vand.u32 4294901760, %v809_v5  ;;  %v2940_v46 = vpack.c.bf16 %v855_v39, %v852_v37 }
 0x5b7   :  { %v766_v7 = vadd.f32 %v765_v51, %v750_v19  ;;  %v849_v19 = vand.u32 4294901760, %v810_v17  ;;  %v814_v51 = vld [vmem:[#allocation7 + $0x78] sm:$0xff] }
 0x5b9   :  { %v2936_v25 = vpack.c.bf16 %v849_v19, %v846_v18 }
 0x5bb   :  { %2266 = vmatpush3.bf16.msra.mxu1 %v2936_v25 }
 0x5bc   :  { %2267 = vmatprep.subr.bf16.mxu1 %v2533_v0 }
 0x5bf   :  { %2269 = vmatpush3.bf16.msra.mxu1 %v2940_v46 }
 0x5c0   :  { %2270 = vmatprep.subr.bf16.mxu1 %v2533_v0 }
 0x642   :  { %v769_v8 = vpop.xlane.xlu1 %768 }
 0x643   :  { %vm770_vm8 = vcmp.eq.f32.partialorder %v767_v47, %v769_v8  ;;  %v774_v24 = vsub.f32 %v769_v8, %v2863_v52  ;;  %v2944_v8 = vsub.f32 %v808_v58, %v843_v60  ;;  %v938_v58 = vsub.f32 %v2906_v44, %v3196_v31 }
 0x644   :  { %v771_v9 = vsel %vm770_vm8, %v2860_v21, 128.0 }
 0x645   :  { %772 = vmin.xlane.f32.xlu0 %v771_v9  ;;  %v775_v30 = vmul.f32 1.442695, %v774_v24  ;;  %v2946_v9 = vsub.f32 %v809_v5, %v846_v18  ;;  %v2948_v24 = vsub.f32 %v810_v17, %v849_v19  ;;  %v939_v60 = vand.u32 4294901760, %v938_v58 }
 0x646   :  { %v3194_v17 = vand.u32 4294901760, %v2914_v48  ;;  %v3193_v18 = vand.u32 4294901760, %v2916_v50 }
 0x647   :  { %2428 = vpow2.f32 %v775_v30  ;;  %v2951_v30 = vsub.f32 %v811_v28, %v852_v37  ;;  %v3189_v6 = vand.u32 4294901760, %v2948_v24 }
 0x648   :  { %v952_v28 = vsub.f32 %v2914_v48, %v3194_v17 }
 0x64a   :  { %v953_v37 = vand.u32 4294901760, %v952_v28 }
 0x651   :  { %v2890_v43 = vpop.eup %2428 }
 0x6d2   :  { %v773_v34 = vpop.xlane.xlu0 %772 }
 0x6d3   :  { %vm778_vm9 = vcmp.eq.f32.partialorder %v2860_v21, %v773_v34  ;;  %v2953_v34 = vsub.f32 %v812_v29, %v855_v39  ;;  %v959_v29 = vsub.f32 %v2916_v50, %v3193_v18 }
 0x6d4   :  { %v1479_v45 = vsel %vm778_vm9, 1.0, %v2535_v38  ;;  %v783_v62 = vsel %vm778_vm9, -inf, %v767_v47  ;;  %v813_v47 = vld [vmem:[#allocation7 + $0x70] sm:$0xff] }
 0x6d5   :  { %v781_v63 = vmul.f32 %v2890_v43, %v1479_v45  ;;  %784 = vmax.xlane.f32.xlu1 %v783_v62  ;;  %v858_v45 = vand.u32 4294901760, %v813_v47  ;;  %v960_v39 = vand.u32 4294901760, %v959_v29 }
 0x6d7   :  { %v2894_v2 = vadd.f32 %v781_v63, %v766_v7  ;;  %v2942_v7 = vsub.f32 %v807_v57, %v840_v59  ;;  %v909_v63 = vand.u32 4294901760, %v2898_v26  ;;  %v2960_v20 = vsub.f32 %v813_v47, %v858_v45 }
 0x6d8   :  { %v2984_v57 = vpack.c.bf16 %v932_v16, %v925_v14  ;;  %v987_v16 = vsub.f32 %v2948_v24, %v3189_v6 }
 0x6d9   :  { %v910_v23 = vsub.f32 %v2898_v26, %v909_v63  ;;  %v3192_v47 = vand.u32 4294901760, %v2942_v7 }
 0x6db   :  { %v911_v42 = vand.u32 4294901760, %v910_v23 }
 0x6dd   :  { %v2980_v13 = vpack.c.bf16 %v918_v1, %v911_v42  ;;  %v3190_v1 = vand.u32 4294901760, %v2946_v9 }
 0x6df   :  { %v980_v14 = vsub.f32 %v2946_v9, %v3190_v1 }
 0x6e1   :  { %v981_v58 = vand.u32 4294901760, %v980_v14 }
 0x762   :  { %v2928_v55 = vpop.xlane.xlu1 %784 }
 0x763   :  { %vm786_vm10 = vcmp.eq.f32.partialorder %v783_v62, %v2928_v55  ;;  %v861_v62 = vand.u32 4294901760, %v814_v51 }
 0x764   :  { %v787_v56 = vsel %vm786_vm10, %v2860_v21, 128.0 }
 0x765   :  { %788 = vmin.xlane.f32.xlu0 %v787_v56  ;;  %v2958_v10 = vpack.c.bf16 %v861_v62, %v858_v45  ;;  %v2962_v22 = vsub.f32 %v814_v51, %v861_v62  ;;  %v3195_v56 = vand.u32 4294901760, %v2911_v11  ;;  %v3191_v51 = vand.u32 4294901760, %v2944_v8 }
 0x766   :  { %v2283_v45 = vpack.c.bf16 %v960_v39, %v953_v37  ;;  %v966_v62 = vsub.f32 %v2942_v7, %v3192_v47 }
 0x767   :  { %2272 = vmatpush3.bf16.msra.mxu1 %v2958_v10  ;;  %v945_v59 = vsub.f32 %v2911_v11, %v3195_v56  ;;  %v973_v23 = vsub.f32 %v2944_v8, %v3191_v51 }
 0x768   :  { %2273 = vmatprep.subr.bf16.mxu1 %v2533_v0  ;;  %v967_v35 = vand.u32 4294901760, %v966_v62 }
 0x769   :  { %v946_v5 = vand.u32 4294901760, %v945_v59  ;;  %v974_v42 = vand.u32 4294901760, %v973_v23  ;;  %v988_v59 = vand.u32 4294901760, %v987_v16  ;;  %v3186_v23 = vand.u32 4294901760, %v2960_v20 }
 0x76b   :  { %v2280_v19 = vpack.c.bf16 %v946_v5, %v939_v60  ;;  %v2286_v12 = vpack.c.bf16 %v974_v42, %v967_v35  ;;  %v3185_v60 = vand.u32 4294901760, %v2951_v30  ;;  %v3188_v5 = vand.u32 4294901760, %v2953_v34 }
 0x76c   :  { %v2289_v28 = vpack.c.bf16 %v988_v59, %v981_v58  ;;  %v3187_v35 = vand.u32 4294901760, %v2962_v22  ;;  %v1008_v14 = vsub.f32 %v2960_v20, %v3186_v23  ;;  %v2310_v23 = vpack.c.bf16 %v2944_v8, %v2942_v7 }
 0x76d   :  { %v994_v29 = vsub.f32 %v2951_v30, %v3185_v60  ;;  %v1001_v37 = vsub.f32 %v2953_v34, %v3188_v5 }
 0x76e   :  { %v1015_v16 = vsub.f32 %v2962_v22, %v3187_v35  ;;  %v1009_v58 = vand.u32 4294901760, %v1008_v14  ;;  %v2313_v14 = vpack.c.bf16 %v2948_v24, %v2946_v9 }
 0x76f   :  { %v995_v39 = vand.u32 4294901760, %v994_v29  ;;  %v1002_v62 = vand.u32 4294901760, %v1001_v37  ;;  %v2298_v29 = vpack.c.bf16 %v2900_v27, %v2898_v26  ;;  %v2301_v37 = vpack.c.bf16 %v2904_v33, %v2902_v32 }
 0x770   :  { %v1016_v59 = vand.u32 4294901760, %v1015_v16  ;;  %v2316_v16 = vpack.c.bf16 %v2953_v34, %v2951_v30  ;;  %v3201_v26 = vand.u32 4294901760, %v2906_v44  ;;  %v3202_v27 = vand.u32 4294901760, %v2911_v11 }
 0x771   :  { %v2292_v42 = vpack.c.bf16 %v1002_v62, %v995_v39  ;;  %v2304_v39 = vpack.c.bf16 %v2911_v11, %v2906_v44  ;;  %v2307_v62 = vpack.c.bf16 %v2916_v50, %v2914_v48  ;;  %v3204_v32 = vand.u32 4294901760, %v2916_v50 }
 0x772   :  { %v2295_v60 = vpack.c.bf16 %v1016_v59, %v1009_v58  ;;  %v2319_v58 = vpack.c.bf16 %v2962_v22, %v2960_v20  ;;  %v790_v59 = vsub.f32 %v2928_v55, %v2863_v52  ;;  %v2352_v55 = vpack.c.bf16 %v3202_v27, %v3201_v26 }
 0x773   :  { %v3207_v44 = vand.u32 4294901760, %v2946_v9  ;;  %v3208_v11 = vand.u32 4294901760, %v2948_v24  ;;  %v3210_v50 = vand.u32 4294901760, %v2953_v34 }
 0x774   :  { %v791_v35 = vmul.f32 1.442695, %v790_v59 }
 0x776   :  { %2430 = vpow2.f32 %v791_v35 }
 0x780   :  { %v3051_v6 = vpop.eup %2430 }
 0x7f2   :  { %v789_v5 = vpop.xlane.xlu0 %788 }
 0x7f3   :  { %vm794_vm11 = vcmp.eq.f32.partialorder %v2860_v21, %v789_v5  ;;  %v2346_v21 = vpack.c.bf16 %v916_v3, %v909_v63  ;;  %v3203_v63 = vand.u32 4294901760, %v2914_v48  ;;  %v3205_v3 = vand.u32 4294901760, %v2942_v7 }
 0x7f4   :  { %v1480_v1 = vsel %vm794_vm11, 1.0, %v2535_v38  ;;  %v3209_v48 = vand.u32 4294901760, %v2951_v30  ;;  %v3211_v7 = vand.u32 4294901760, %v2960_v20 }
 0x7f5   :  { %v797_v51 = vmul.f32 %v3051_v6, %v1480_v1  ;;  %v2355_v33 = vpack.c.bf16 %v3204_v32, %v3203_v63 }
 0x7f7   :  { %v798_v47 = vadd.f32 %v797_v51, %v2894_v2  ;;  %v2349_v2 = vpack.c.bf16 %v930_v41, %v923_v36  ;;  %v3206_v36 = vand.u32 4294901760, %v2944_v8  ;;  %v3212_v8 = vand.u32 4294901760, %v2962_v22 }
 0x7f9   :  { %v3056_v18 = vand.u32 4294901760, %v798_v47  ;;  %v2358_v41 = vpack.c.bf16 %v3206_v36, %v3205_v3 }
 0x7fb   :  { %v897_v17 = vsub.f32 %v798_v47, %v3056_v18 }
 0x7fd   :  { %v898_v56 = vand.u32 4294901760, %v897_v17 }
 0x7ff   :  { %v899_v31 = vsub.f32 %v897_v17, %v898_v56 }
 0x801   :  { %v900_v52 = vand.u32 4294901760, %v899_v31  ;;  %v2364_v31 = vpack.c.bf16 %v3210_v50, %v3209_v48 }
 0x803   :  { %1928 = vmatmul.mubr.f32.vlgmr.msra.gmra.mrb[0].mxu1 %v900_v52 }
 0x804   :  { %2275 = vmatpush3.bf16.msra.mxu1 %v2980_v13  ;;  %1962 = vmatprep.mubr.msk.f32.mxu1 %vm2534_vm0, %v2535_v38  ;;  %v2361_v13 = vpack.c.bf16 %v3208_v11, %v3207_v44 }
 0x805   :  { %2276 = vmatprep.subr.bf16.mxu1 %v2533_v0 }
 0x808   :  { %2278 = vmatpush3.bf16.msra.mxu1 %v2984_v57 }
 0x809   :  { %2279 = vmatprep.subr.bf16.mxu1 %v2533_v0 }
 0x80c   :  { %2281 = vmatpush3.bf16.msra.mxu1 %v2280_v19 }
 0x80d   :  { %2282 = vmatprep.subr.bf16.mxu1 %v2533_v0 }
 0x810   :  { %2284 = vmatpush3.bf16.msra.mxu1 %v2283_v45 }
 0x811   :  { %2285 = vmatprep.subr.bf16.mxu1 %v2533_v0 }
 0x814   :  { %2287 = vmatpush3.bf16.msra.mxu1 %v2286_v12 }
 0x815   :  { %2288 = vmatprep.subr.bf16.mxu1 %v2533_v0 }
 0x818   :  { %2290 = vmatpush3.bf16.msra.mxu1 %v2289_v28 }
 0x819   :  { %2291 = vmatprep.subr.bf16.mxu1 %v2533_v0 }
 0x81c   :  { %2293 = vmatpush3.bf16.msra.mxu1 %v2292_v42 }
 0x81d   :  { %2294 = vmatprep.subr.bf16.mxu1 %v2533_v0 }
 0x820   :  { %2296 = vmatpush3.bf16.msra.mxu1 %v2295_v60 }
 0x821   :  { %2297 = vmatprep.subr.bf16.mxu1 %v2533_v0 }
 0x823   :  { %1963 = vmatmul.mubr.f32.vlgmr.msra.gmra.mrb[0].mxu1 %v3056_v18 }
 0x824   :  { %2299 = vmatpush3.bf16.msra.mxu1 %v2298_v29  ;;  %1997 = vmatprep.mubr.msk.f32.mxu1 %vm2534_vm0, %v2535_v38 }
 0x825   :  { %2300 = vmatprep.subr.bf16.mxu1 %v2533_v0 }
 0x828   :  { %2302 = vmatpush3.bf16.msra.mxu1 %v2301_v37 }
 0x829   :  { %2303 = vmatprep.subr.bf16.mxu1 %v2533_v0 }
 0x82c   :  { %2305 = vmatpush3.bf16.msra.mxu1 %v2304_v39 }
 0x82d   :  { %2306 = vmatprep.subr.bf16.mxu1 %v2533_v0 }
 0x830   :  { %2308 = vmatpush3.bf16.msra.mxu1 %v2307_v62 }
 0x831   :  { %2309 = vmatprep.subr.bf16.mxu1 %v2533_v0 }
 0x834   :  { %2311 = vmatpush3.bf16.msra.mxu1 %v2310_v23 }
 0x835   :  { %2312 = vmatprep.subr.bf16.mxu1 %v2533_v0 }
 0x838   :  { %2314 = vmatpush3.bf16.msra.mxu1 %v2313_v14 }
 0x839   :  { %2315 = vmatprep.subr.bf16.mxu1 %v2533_v0 }
 0x83c   :  { %2317 = vmatpush3.bf16.msra.mxu1 %v2316_v16 }
 0x83d   :  { %2318 = vmatprep.subr.bf16.mxu1 %v2533_v0 }
 0x840   :  { %2320 = vmatpush3.bf16.msra.mxu1 %v2319_v58 }
 0x841   :  { %2321 = vmatprep.subr.bf16.mxu1 %v2533_v0 }
 0x843   :  { %1998 = vmatmul.mubr.f32.vlgmr.msra.gmra.mrb[0].mxu1 %v897_v17 }
 0x844   :  { %2323 = vmatpush3.bf16.msra.mxu1 %v2896_v15  ;;  %2032 = vmatprep.mubr.msk.f32.mxu1 %vm2534_vm0, %v2535_v38 }
 0x845   :  { %2324 = vmatprep.subr.bf16.mxu1 %v2533_v0 }
 0x848   :  { %2326 = vmatpush3.bf16.msra.mxu1 %v2909_v49 }
 0x849   :  { %2327 = vmatprep.subr.bf16.mxu1 %v2533_v0 }
 0x84c   :  { %2329 = vmatpush3.bf16.msra.mxu1 %v2919_v53 }
 0x84d   :  { %2330 = vmatprep.subr.bf16.mxu1 %v2533_v0 }
 0x850   :  { %2332 = vmatpush3.bf16.msra.mxu1 %v2923_v54 }
 0x851   :  { %2333 = vmatprep.subr.bf16.mxu1 %v2533_v0 }
 0x854   :  { %2335 = vmatpush3.bf16.msra.mxu1 %v2932_v4 }
 0x855   :  { %2336 = vmatprep.subr.bf16.mxu1 %v2533_v0 }
 0x858   :  { %2338 = vmatpush3.bf16.msra.mxu1 %v2936_v25 }
 0x859   :  { %2339 = vmatprep.subr.bf16.mxu1 %v2533_v0 }
 0x85c   :  { %2341 = vmatpush3.bf16.msra.mxu1 %v2940_v46 }
 0x85d   :  { %2342 = vmatprep.subr.bf16.mxu1 %v2533_v0 }
 0x860   :  { %2344 = vmatpush3.bf16.msra.mxu1 %v2958_v10 }
 0x861   :  { %2345 = vmatprep.subr.bf16.mxu1 %v2533_v0 }
 0x863   :  { %2033 = vmatmul.mubr.f32.vlgmr.msra.gmra.mrb[0].mxu1 %v898_v56  ;;  %v2367_v56 = vpack.c.bf16 %v3212_v8, %v3211_v7 }
 0x864   :  { %2347 = vmatpush3.bf16.msra.mxu1 %v2346_v21  ;;  %2067 = vmatprep.mubr.msk.f32.mxu1 %vm2534_vm0, %v2535_v38 }
 0x865   :  { %2348 = vmatprep.subr.bf16.mxu1 %v2533_v0 }
 0x868   :  { %2350 = vmatpush3.bf16.msra.mxu1 %v2349_v2 }
 0x869   :  { %2351 = vmatprep.subr.bf16.mxu1 %v2533_v0 }
 0x86c   :  { %2353 = vmatpush3.bf16.msra.mxu1 %v2352_v55 }
 0x86d   :  { %2354 = vmatprep.subr.bf16.mxu1 %v2533_v0 }
 0x870   :  { %2356 = vmatpush3.bf16.msra.mxu1 %v2355_v33 }
 0x871   :  { %2357 = vmatprep.subr.bf16.mxu1 %v2533_v0 }
 0x874   :  { %2359 = vmatpush3.bf16.msra.mxu1 %v2358_v41 }
 0x875   :  { %2360 = vmatprep.subr.bf16.mxu1 %v2533_v0 }
 0x878   :  { %2362 = vmatpush3.bf16.msra.mxu1 %v2361_v13 }
 0x879   :  { %2363 = vmatprep.subr.bf16.mxu1 %v2533_v0 }
 0x87c   :  { %2365 = vmatpush3.bf16.msra.mxu1 %v2364_v31 }
 0x87d   :  { %2366 = vmatprep.subr.bf16.mxu1 %v2533_v0 }
 0x880   :  { %2368 = vmatpush3.bf16.msra.mxu1 %v2367_v56 }
 0x881   :  { %2369 = vmatprep.subr.bf16.mxu1 %v2533_v0 }
 0x883   :  { %2068 = vmatmul.mubr.f32.vlgmr.msra.gmra.mrb[0].mxu1 %v3056_v18 }
 0x884   :  { %2371 = vmatpush3.bf16.msra.mxu1 %v2896_v15  ;;  %2102 = vmatprep.mubr.msk.f32.mxu1 %vm2534_vm0, %v2535_v38  ;;  %v745_v38 = vadd.f32 1.0, %v2873_v61 }
 0x885   :  { %2372 = vmatprep.subr.bf16.mxu1 %v2533_v0 }
 0x886   :  { %v761_v15 = vadd.f32 %v2883_v40, %v745_v38 }
 0x888   :  { %2374 = vmatpush3.bf16.msra.mxu1 %v2909_v49  ;;  %v777_v49 = vadd.f32 %v2890_v43, %v761_v15 }
 0x889   :  { %2375 = vmatprep.subr.bf16.mxu1 %v2533_v0 }
 0x88c   :  { %2377 = vmatpush3.bf16.msra.mxu1 %v2919_v53  ;;  %v793_v53 = vadd.f32 %v3051_v6, %v777_v49 }
 0x88d   :  { %2378 = vmatprep.subr.bf16.mxu1 %v2533_v0 }
 0x88e   :  { %2432 = vrcp.f32 %v793_v53 }
 0x890   :  { %2380 = vmatpush3.bf16.msra.mxu1 %v2923_v54 }
 0x891   :  { %2381 = vmatprep.subr.bf16.mxu1 %v2533_v0 }
 0x894   :  { %2383 = vmatpush3.bf16.msra.mxu1 %v2932_v4 }
 0x895   :  { %2384 = vmatprep.subr.bf16.mxu1 %v2533_v0 }
 0x898   :  { %2386 = vmatpush3.bf16.msra.mxu1 %v2936_v25  ;;  %v2433_v54 = vpop.eup %2432 }
 0x899   :  { %2387 = vmatprep.subr.bf16.mxu1 %v2533_v0 }
 0x89c   :  { %2389 = vmatpush3.bf16.msra.mxu1 %v2940_v46 }
 0x89d   :  { %2390 = vmatprep.subr.bf16.mxu1 %v2533_v0 }
 0x8a0   :  { %2392 = vmatpush3.bf16.msra.mxu1 %v2958_v10 }
 0x8a3   :  { %2103 = vmatmul.mubr.f32.vlgmr.msra.gmra.mrb[0].mxu1 %v3056_v18 }
 0x976   :  { %v1452_v4 = vpop.f32.mrb[0].mxu1 }
 0x977   :  { %v1458_v25 = vmul.f32 %v2433_v54, %v1452_v4  ;;  %v2104_v46 = vpop.f32.mrb[1].mxu1 }
 0x979   :  { %1459 = vst [vmem:[#allocation8] sm:$0xff] %v1458_v25 }
 0x97a   :  { %2511 = shalt.err (!%p2508_p0)
}
 0x97b   :  { %s2512_s25 = scalar_lea.hbm %s3180_s3, 128 }
 0x97c   :  { %p2513_p1 = scmp.ne.s32.totalorder %s3180_s3, %s2512_s25  ;;  %p2516_p2 = scmp.lt.u32.totalorder %s2512_s25, %s3180_s3 }
 0x97e   :  { %p2518_p3 = pnand %p2516_p2, %p2513_p1 }
 0x980   :  { %2521 = shalt.err (!%p2518_p3)
}
 0x981   :  { %1469 = dma.vmem_to_hbm [thread:$0]  %s1467_s21, 128, %s3180_s3, [#allocation4]  }
 0x982   :  { %2526 = dma.done.wait [#allocation4], 128  }
 0x983   :  { %2527 = vsyncadd [#allocation4], 4294967168 }
 0x984   :  { %1473 = vsyncpa [#allocation3], 1 }
 0x985   :  { %1474 = vsyncpa [#allocation6], 1 }
 0x986   :  { %1475 = vsyncpa [#allocation4], 1 }

</bundles_post_ra>
